<compile_context>
chip_gen: v5e
topology: v5e:2x2
jax: 0.10.0
libtpu: 0.0.40
codegen_flags: <defaults>
</compile_context>

<pallas_src>
import functools

import jax
import jax.numpy as jnp
import numpy as np
from jax.experimental import pallas as pl
from jax.experimental.pallas import tpu as pltpu


def _mlp_block_kernel(x_ref, w_ref, b_ref, g_ref, beta_ref, o_ref, acc_ref, *, eps):
    # x_ref    : (B, TK)     full batch, K-slab of flattened features
    # w_ref    : (TK, TN)    weight slab (hidden on the lane axis)
    # b_ref / g_ref / beta_ref : (1, TN)
    # o_ref    : (B, TN)
    # acc_ref  : (B, TN) f32 VMEM accumulator (persists across the K axis)
    k = pl.program_id(1)

    @pl.when(k == 0)
    def _():
        acc_ref[...] = jnp.zeros_like(acc_ref)

    acc_ref[...] += jnp.dot(
        x_ref[...], w_ref[...], preferred_element_type=jnp.float32
    )

    @pl.when(k == pl.num_programs(1) - 1)
    def _():
        y = acc_ref[...] + b_ref[...]                        # Linear bias
        # BatchNorm1d (training mode): batch mean + biased variance per feature.
        mu = jnp.mean(y, axis=0, keepdims=True)
        var = jnp.mean(jnp.square(y - mu), axis=0, keepdims=True)
        y = (y - mu) * jax.lax.rsqrt(var + eps)              # rsqrt -> EUP slot
        y = y * g_ref[...] + beta_ref[...]                   # affine
        o_ref[...] = jnp.maximum(y, 0.0).astype(o_ref.dtype)  # ReLU


def _pick_tile(dim, max_tile):
    """Largest multiple of 128 that divides `dim` and is <= max_tile; else full dim."""
    if dim % 128 != 0:
        return dim
    best = 128
    t = 128
    upper = min(dim, max_tile)
    while t <= upper:
        if dim % t == 0:
            best = t
        t += 128
    return best


class MLPBlockPallas:
    """Pallas equivalent of MLPBlock: Linear -> BatchNorm1d -> ReLU on x.view(B, -1)."""

    def __init__(self, in_dim, hidden_dim, h_size, w_size, key):
        self.in_dim = in_dim
        self.hidden_dim = hidden_dim
        self.h_size = h_size      # unused in forward (matches PyTorch module)
        self.w_size = w_size      # unused in forward (matches PyTorch module)
        self.eps = 1e-5

        stdv = float(1.0 / np.sqrt(in_dim))
        k_w, k_b = jax.random.split(key, 2)
        # PyTorch nn.Linear default init: uniform(-1/sqrt(in_dim), 1/sqrt(in_dim)).
        # Stored PyTorch-style (hidden, in_dim) for the reference path.
        self.weight = jax.random.uniform(
            k_w, (hidden_dim, in_dim), jnp.float32, -stdv, stdv)
        self.bias = jax.random.uniform(
            k_b, (hidden_dim,), jnp.float32, -stdv, stdv)
        # BatchNorm1d affine params (default init).
        self.gamma = jnp.ones((hidden_dim,), jnp.float32)
        self.beta = jnp.zeros((hidden_dim,), jnp.float32)

        # One-time layout plumbing: hidden on the lane axis, params as (1, H) rows.
        self.w_t = jnp.transpose(self.weight, (1, 0))        # (in_dim, hidden)
        self.b2d = self.bias.reshape(1, hidden_dim)
        self.g2d = self.gamma.reshape(1, hidden_dim)
        self.beta2d = self.beta.reshape(1, hidden_dim)

    # ---- Pallas forward ----
    def forward(self, x):
        B = x.shape[0]
        x2d = x.reshape(B, -1)                               # x.view(B, -1)
        assert x2d.shape[1] == self.in_dim, (x2d.shape, self.in_dim)
        H = self.hidden_dim
        K = self.in_dim

        # Lane-dense output blocks; full-width fallback if not a multiple of 128.
        TN = 128 if H % 128 == 0 else H
        # Contraction tiles: biggest multiple of 128 dividing K that keeps the
        # double-buffered weight slab comfortably inside scoped VMEM.
        TK = _pick_tile(K, max_tile=4096)

        grid = (H // TN, K // TK)
        kernel = functools.partial(_mlp_block_kernel, eps=self.eps)

        bytes_accessed = 4 * (x2d.size * (H // TN) + self.w_t.size + 3 * H + B * H)
        cost = pl.CostEstimate(
            flops=2 * B * K * H + 10 * B * H,
            transcendentals=H,
            bytes_accessed=bytes_accessed)

        out = pl.pallas_call(
            kernel,
            out_shape=jax.ShapeDtypeStruct((B, H), x.dtype),
            grid_spec=pltpu.PrefetchScalarGridSpec(
                num_scalar_prefetch=0,
                grid=grid,
                in_specs=[
                    pl.BlockSpec((B, TK), lambda j, k: (0, k)),   # x K-slab, full batch
                    pl.BlockSpec((TK, TN), lambda j, k: (k, j)),  # weight slab
                    pl.BlockSpec((1, TN), lambda j, k: (0, j)),   # bias
                    pl.BlockSpec((1, TN), lambda j, k: (0, j)),   # gamma
                    pl.BlockSpec((1, TN), lambda j, k: (0, j)),   # beta
                ],
                out_specs=pl.BlockSpec((B, TN), lambda j, k: (0, j)),
                scratch_shapes=[pltpu.VMEM((B, TN), jnp.float32)],
            ),
            compiler_params=pltpu.CompilerParams(
                dimension_semantics=("parallel", "arbitrary"),
                vmem_limit_bytes=64 * 1024 * 1024),
            cost_estimate=cost,
        )(x2d, self.w_t, self.b2d, self.g2d, self.beta2d)
        return out

    # ---- pure-JAX reference (correctness check only) ----
    def reference(self, x):
        B = x.shape[0]
        x2d = x.reshape(B, -1)
        y = x2d @ self.weight.T + self.bias
        mu = jnp.mean(y, axis=0, keepdims=True)
        var = jnp.mean(jnp.square(y - mu), axis=0, keepdims=True)  # biased, like BN train
        y = (y - mu) / jnp.sqrt(var + self.eps)
        y = y * self.gamma + self.beta
        return jnp.maximum(y, 0.0)


if __name__ == "__main__":
    key = jax.random.PRNGKey(0)
    k_param, k_x = jax.random.split(key)

    # Small shapes consistent with the module: x is (B, C, H, W), flattened to in_dim.
    B, C, Hs, Ws = 2, 4, 16, 16
    in_dim = C * Hs * Ws                 # 1024 -> single K step after tiling
    hidden_dim = 256                     # 2 lane-dense blocks of 128 -> parallel grid of 2

    mod = MLPBlockPallas(in_dim, hidden_dim, Hs, Ws, k_param)
    x = jax.random.normal(k_x, (B, C, Hs, Ws), jnp.float32)

    out = jax.block_until_ready(mod.forward(x))
    ref = jax.block_until_ready(mod.reference(x))

    assert out.shape == (B, hidden_dim), out.shape
    np.testing.assert_allclose(np.asarray(out), np.asarray(ref), rtol=1e-4, atol=1e-4)
    print("KERNEL_OK")
</pallas_src>

<mosaic_0001>
module attributes {stable_mosaic.version = 11 : i64} {
  func.func @_mlp_block_kernel(%arg0: i32, %arg1: i32, %arg2: memref<2x1024xf32, #tpu.memory_space<vmem>>, %arg3: memref<1024x128xf32, #tpu.memory_space<vmem>>, %arg4: memref<1x128xf32, #tpu.memory_space<vmem>>, %arg5: memref<1x128xf32, #tpu.memory_space<vmem>>, %arg6: memref<1x128xf32, #tpu.memory_space<vmem>>, %arg7: memref<2x128xf32, #tpu.memory_space<vmem>>, %arg8: memref<2x128xf32, #tpu.memory_space<vmem>>) attributes {dimension_semantics = [#tpu.dimension_semantics<parallel>, #tpu.dimension_semantics<arbitrary>], iteration_bounds = array<i64: 2, 1>, scalar_prefetch = 0 : i64, scratch_operands = 1 : i64, tpu.core_type = #tpu.core_type<tc>, window_params = [{transform_indices = @transform_0, window_bounds = array<i64: 2, 1024>}, {transform_indices = @transform_1, window_bounds = array<i64: 1024, 128>}, {transform_indices = @transform_2, window_bounds = array<i64: 1, 128>}, {transform_indices = @transform_3, window_bounds = array<i64: 1, 128>}, {transform_indices = @transform_4, window_bounds = array<i64: 1, 128>}, {transform_indices = @transform_5, window_bounds = array<i64: 2, 128>}]} {
    %c0_i32 = arith.constant 0 : i32
    %0 = arith.cmpi eq, %arg1, %c0_i32 : i32
    %1 = arith.extui %0 : i1 to i32
    %c0_i32_0 = arith.constant 0 : i32
    %2 = arith.cmpi ne, %1, %c0_i32_0 : i32
    scf.if %2 {
      %cst_10 = arith.constant 0.000000e+00 : f32
      %12 = vector.broadcast %cst_10 : f32 to vector<2x128xf32>
      %c0_11 = arith.constant 0 : index
      %c0_12 = arith.constant 0 : index
      %13 = vector.load %arg8[%c0_11, %c0_12] : memref<2x128xf32, #tpu.memory_space<vmem>>, vector<2x128xf32>
      tpu.vector_store %arg8[%c0_11, %c0_12], %12 {strides = array<i32>} : memref<2x128xf32, #tpu.memory_space<vmem>>, vector<2x128xf32>,
    } else {
    }
    %c0 = arith.constant 0 : index
    %c0_1 = arith.constant 0 : index
    %3 = vector.load %arg8[%c0, %c0_1] : memref<2x128xf32, #tpu.memory_space<vmem>>, vector<2x128xf32>
    %c0_2 = arith.constant 0 : index
    %c0_3 = arith.constant 0 : index
    %4 = vector.load %arg2[%c0_2, %c0_3] : memref<2x1024xf32, #tpu.memory_space<vmem>>, vector<2x1024xf32>
    %c0_4 = arith.constant 0 : index
    %c0_5 = arith.constant 0 : index
    %5 = vector.load %arg3[%c0_4, %c0_5] : memref<1024x128xf32, #tpu.memory_space<vmem>>, vector<1024x128xf32>
    %cst = arith.constant dense<0.000000e+00> : vector<2x128xf32>
    %6 = tpu.matmul %4, %5, %cst {dimension_numbers = #tpu.dot_dimension_numbers<[1], [0], [0], [1], [0, 0, 1, 1], [], []>} : vector<2x1024xf32>, vector<1024x128xf32>, vector<2x128xf32> -> vector<2x128xf32>
    %7 = arith.addf %3, %6 : vector<2x128xf32>
    %c0_6 = arith.constant 0 : index
    %c0_7 = arith.constant 0 : index
    %8 = vector.load %arg8[%c0_6, %c0_7] : memref<2x128xf32, #tpu.memory_space<vmem>>, vector<2x128xf32>
    tpu.vector_store %arg8[%c0_6, %c0_7], %7 {strides = array<i32>} : memref<2x128xf32, #tpu.memory_space<vmem>>, vector<2x128xf32>,
    %c0_i32_8 = arith.constant 0 : i32
    %9 = arith.cmpi eq, %arg1, %c0_i32_8 : i32
    %10 = arith.extui %9 : i1 to i32
    %c0_i32_9 = arith.constant 0 : i32
    %11 = arith.cmpi ne, %10, %c0_i32_9 : i32
    scf.if %11 {
      %c0_10 = arith.constant 0 : index
      %c0_11 = arith.constant 0 : index
      %12 = vector.load %arg8[%c0_10, %c0_11] : memref<2x128xf32, #tpu.memory_space<vmem>>, vector<2x128xf32>
      %c0_12 = arith.constant 0 : index
      %c0_13 = arith.constant 0 : index
      %13 = vector.load %arg4[%c0_12, %c0_13] : memref<1x128xf32, #tpu.memory_space<vmem>>, vector<1x128xf32>
      %14 = vector.broadcast %13 : vector<1x128xf32> to vector<2x128xf32>
      %15 = arith.addf %12, %14 : vector<2x128xf32>
      %cst_14 = arith.constant dense<0.000000e+00> : vector<128xf32>
      %16 = vector.multi_reduction <add>, %15, %cst_14 [0] : vector<2x128xf32> to vector<128xf32>
      %17 = vector.shape_cast %16 : vector<128xf32> to vector<1x128xf32>
      %cst_15 = arith.constant 2.000000e+00 : f32
      %18 = vector.broadcast %cst_15 : f32 to vector<1x128xf32>
      %19 = arith.divf %17, %18 : vector<1x128xf32>
      %20 = vector.broadcast %19 : vector<1x128xf32> to vector<2x128xf32>
      %21 = arith.subf %15, %20 : vector<2x128xf32>
      %22 = arith.mulf %21, %21 : vector<2x128xf32>
      %cst_16 = arith.constant dense<0.000000e+00> : vector<128xf32>
      %23 = vector.multi_reduction <add>, %22, %cst_16 [0] : vector<2x128xf32> to vector<128xf32>
      %24 = vector.shape_cast %23 : vector<128xf32> to vector<1x128xf32>
      %cst_17 = arith.constant 2.000000e+00 : f32
      %25 = vector.broadcast %cst_17 : f32 to vector<1x128xf32>
      %26 = arith.divf %24, %25 : vector<1x128xf32>
      %27 = vector.broadcast %19 : vector<1x128xf32> to vector<2x128xf32>
      %28 = arith.subf %15, %27 : vector<2x128xf32>
      %cst_18 = arith.constant 9.99999974E-6 : f32
      %29 = vector.broadcast %cst_18 : f32 to vector<1x128xf32>
      %30 = arith.addf %26, %29 : vector<1x128xf32>
      %31 = math.rsqrt %30 : vector<1x128xf32>
      %32 = vector.broadcast %31 : vector<1x128xf32> to vector<2x128xf32>
      %33 = arith.mulf %28, %32 : vector<2x128xf32>
      %c0_19 = arith.constant 0 : index
      %c0_20 = arith.constant 0 : index
      %34 = vector.load %arg5[%c0_19, %c0_20] : memref<1x128xf32, #tpu.memory_space<vmem>>, vector<1x128xf32>
      %35 = vector.broadcast %34 : vector<1x128xf32> to vector<2x128xf32>
      %36 = arith.mulf %33, %35 : vector<2x128xf32>
      %c0_21 = arith.constant 0 : index
      %c0_22 = arith.constant 0 : index
      %37 = vector.load %arg6[%c0_21, %c0_22] : memref<1x128xf32, #tpu.memory_space<vmem>>, vector<1x128xf32>
      %38 = vector.broadcast %37 : vector<1x128xf32> to vector<2x128xf32>
      %39 = arith.addf %36, %38 : vector<2x128xf32>
      %cst_23 = arith.constant 0.000000e+00 : f32
      %40 = vector.broadcast %cst_23 : f32 to vector<2x128xf32>
      %41 = arith.maximumf %39, %40 : vector<2x128xf32>
      %c0_24 = arith.constant 0 : index
      %c0_25 = arith.constant 0 : index
      %42 = vector.load %arg7[%c0_24, %c0_25] : memref<2x128xf32, #tpu.memory_space<vmem>>, vector<2x128xf32>
      tpu.vector_store %arg7[%c0_24, %c0_25], %41 {strides = array<i32>} : memref<2x128xf32, #tpu.memory_space<vmem>>, vector<2x128xf32>,
    } else {
    }
    return
  }
  func.func @transform_0(%arg0: i32, %arg1: i32) -> (i32, i32) {
    %c0_i32 = arith.constant 0 : i32
    %c0_i32_0 = arith.constant 0 : i32
    return %c0_i32, %arg1 : i32, i32
  }
  func.func @transform_1(%arg0: i32, %arg1: i32) -> (i32, i32) {
    %c0_i32 = arith.constant 0 : i32
    return %arg1, %arg0 : i32, i32
  }
  func.func @transform_2(%arg0: i32, %arg1: i32) -> (i32, i32) {
    %c0_i32 = arith.constant 0 : i32
    %c0_i32_0 = arith.constant 0 : i32
    return %c0_i32, %arg0 : i32, i32
  }
  func.func @transform_3(%arg0: i32, %arg1: i32) -> (i32, i32) {
    %c0_i32 = arith.constant 0 : i32
    %c0_i32_0 = arith.constant 0 : i32
    return %c0_i32, %arg0 : i32, i32
  }
  func.func @transform_4(%arg0: i32, %arg1: i32) -> (i32, i32) {
    %c0_i32 = arith.constant 0 : i32
    %c0_i32_0 = arith.constant 0 : i32
    return %c0_i32, %arg0 : i32, i32
  }
  func.func @transform_5(%arg0: i32, %arg1: i32) -> (i32, i32) {
    %c0_i32 = arith.constant 0 : i32
    %c0_i32_0 = arith.constant 0 : i32
    return %c0_i32, %arg0 : i32, i32
  }
}

</mosaic_0001>

<bundles_post_ra>
// kernel: tpu_custom_call.1
= control target key start
LH: loop header
LB: loop body
LE: loop exit
PB: predicated region body
PF: predicated region fallthrough
CT: control target
= control target key end

     0   :  { %s1594_s0 = inlined_call_operand.hbm [shape: f32[2,1024], index: 0, kind: input, shape index: {}]   ;;  %s1595_s1 = inlined_call_operand.hbm [shape: f32[1024,256], index: 1, kind: input, shape index: {}]   ;;  %s1596_s2 = inlined_call_operand.hbm [shape: f32[1,256], index: 2, kind: input, shape index: {}]   ;;  %s1597_s3 = inlined_call_operand.vmem [shape: f32[1,256], index: 3, kind: input, shape index: {}]   ;;  %s1598_s4 = inlined_call_operand.hbm [shape: f32[1,256], index: 4, kind: input, shape index: {}]   ;;  %s1599_s5 = inlined_call_operand.hbm [shape: f32[2,256], index: 5, kind: output, shape index: {}]  }
   0x1   :  { %1601 = sst [smem:[#allocation18_spill]] %s1594_s0 }
   0x2   :  { %1602 = sst [smem:[#allocation19_spill]] %s1595_s1 }
   0x3   :  { %10 = vsyncpa [#allocation4], 0 }
   0x4   :  { %11 = vsyncpa [#allocation7], 0 }
   0x5   :  { %13 = vsyncpa [#allocation7 + $0x1], 0 }
   0x6   :  { %14 = vsyncpa [#allocation10], 0 }
   0x7   :  { %16 = vsyncpa [#allocation10 + $0x1], 0 }
   0x8   :  { %17 = vsyncpa [#allocation5], 0 }
   0x9   :  { %19 = vsyncpa [#allocation5 + $0x1], 0  ;;  %s1257_s18 = smov 0   ;;  %s1259_s19 = smov 0  }
   0xa   :  { %s1261_s20 = smov 0   ;;  %s1263_s21 = smov 0  }
   0xb   :  { %s1265_s22 = smov 0   ;;  %s1267_s23 = smov 0  }
   0xc LB: > { %s37_s24 = sadd.s32 1, %s1215_s22  ;;  %s72_s25 = sadd.s32 1, %s1207_s20  ;;  %s1219_s23 = sphi %s1267_s23, %s25_s23   ;;  %s1215_s22 = sphi %s1265_s22, %s1619_s22   ;;  %s1211_s21 = sphi %s1263_s21, %s1618_s21   ;;  %s1207_s20 = sphi %s1261_s20, %s1617_s20   ;;  %s1203_s19 = sphi %s1259_s19, %s1616_s19   ;;  %s1199_s18 = sphi %s1257_s18, %s1615_s18  }
   0xd   : > { %p39_p0 = scmp.ge.s32.totalorder %s37_s24, 2  ;;  %p79_p1 = scmp.ne.s32.totalorder %s1207_s20, %s1203_s19 }
   0xe   : > { %p80_p2 = scmp.eq.s32.totalorder %s1219_s23, 0  ;;  %p903_p3 = scmp.ge.s32.totalorder %s1219_s23, 2 }
   0xf   : > { %s1621_s24 = smov (%p39_p0, %s37_s24), 0  ;;  %p945_p5 = scmp.lt.s32.totalorder %s1219_s23, 2 }
  0x10   : > { %1603 = sst [smem:[#allocation16_spill]] %s1621_s24  ;;  %p1298_p4 = por %p80_p2, %p79_p1 }
  0x11   : > { %s68_s27 = ssub.s32 %s1215_s22, %s1621_s24  ;;  %s228_s28 = sand.u32 1, %s1219_s23  }
  0x12   : > { %p70_p6 = scmp.eq.s32.totalorder %s68_s27, 0  ;;  %s1307_s29 = sand.u32 1, %s1207_s20  }
  0x13   : > { %s905_s30 = sshll.u32 %s1215_s22, 3  ;;  %s904_s7 = sshll.u32 %s1307_s29, 10 }
  0x14   : > { %s1311_s6 = scalar_select %p70_p6, %s1207_s20, %s72_s25  }
  0x15   : > { %s1606_s1 = sld [smem:[#allocation19_spill]]  ;;  %s232_s12 = scalar_lea.vmem [#allocation6], %s904_s7 }
  0x16   : > { %1605 = sst [smem:[#allocation17_spill]] %s1311_s6  ;;  %s242_s13 = sshll.u32 %s232_s12, 4  ;;  %s243_s13 = int_to_ptr.vmem [resolvable:$true] %s242_s13 }
  0x17   : > { %p1321_p7 = pnand %p945_p5, %p1298_p4  ;;  %s1325_s15 = scalar_lea.sflag [#allocation7], %s228_s28 }
  0x18   : > { %s1221_s16 = smov 256   ;;  %s1222_s17 = smov 128  }
  0x19   : > { %s1223_s25 = smov 8   ;;  %s1331_s27 = sadd.s32 4294967295, %s1219_s23  }
  0x1a   : > { %s900_s26 = sadd.s32 4294967294, %s1219_s23   ;;  %p85_p8 = scmp.ne.s32.totalorder %s1203_s19, %s1199_s18 }
  0x1b   : > { %s239_s10 = scalar_lea.hbm %s1606_s1, %s905_s30  ;;  %p86_p9 = scmp.eq.s32.totalorder %s1331_s27, 0 }
  0x1c   : > { %s240_s11 = sshll.u32 %s239_s10, 4  ;;  %p187_p10 = scmp.eq.s32.totalorder %s1331_s27, 1  ;;  %s241_s11 = int_to_ptr.hbm [resolvable:$true] %s240_s11 }
  0x1d   : > { %933 = dma.hbm_to_vmem [thread:$0]  (!%p1321_p7), %s241_s11, 16384, %s243_s13, %s1325_s15, %s1221_s16, %s1222_s17, %s1223_s25  }
  0x1e   : > { %p193_p11 = scmp.eq.s32.totalorder %s900_s26, 1  ;;  %p1340_p12 = por %p86_p9, %p85_p8 }
  0x1f   : > { %p901_p13 = scmp.ge.s32.totalorder %s1219_s23, 1  ;;  %p1348_p0 = por %p187_p10, %p79_p1 }
  0x20   : > { %p1352_p2 = por %p193_p11, %p85_p8  ;;  %p200_p4 = scmp.lt.s32.totalorder %s1219_s23, 3 }
  0x21   : > { %s1611_s0 = sld [smem:[#allocation18_spill]]  ;;  %s1224_s12 = smov [#allocation3]  }
  0x22   : > { %p1360_p5 = pnand %p901_p13, %p200_p4  ;;  %s217_s13 = sshll.u32 %s1224_s12, 4  ;;  %s218_s13 = int_to_ptr.vmem [resolvable:$true] %s217_s13 }
  0x23   : > { %s258_s25 = scalar_lea.hbm %s1596_s2, %s1215_s22  ;;  %s255_s26 = scalar_lea.vmem [#allocation8], %s1307_s29 }
  0x24   : > { %p926_p1 = pneg %p1360_p5  ;;  %s262_s8 = sshll.u32 %s255_s26, 4  ;;  %s263_s8 = int_to_ptr.vmem [resolvable:$true] %s262_s8 }
  0x25   : > { %s260_s9 = sshll.u32 %s258_s25, 4  ;;  %s281_s1 = scalar_lea.hbm %s1598_s4, %s1215_s22  ;;  %s261_s9 = int_to_ptr.hbm [resolvable:$true] %s260_s9 }
  0x26   : > { %p927_p6 = pnand %p926_p1, %p86_p9  ;;  %s283_s24 = sshll.u32 %s281_s1, 4  ;;  %s284_s24 = int_to_ptr.hbm [resolvable:$true] %s283_s24 }
  0x27   : > { %s215_s10 = sshll.u32 %s1611_s0, 4  ;;  %s278_s6 = scalar_lea.vmem [#allocation9], %s1307_s29  ;;  %s216_s10 = int_to_ptr.hbm [resolvable:$true] %s215_s10 }
  0x28   : > { %929 = dma.hbm_to_vmem [thread:$0]  (!%p927_p6), %s216_s10, 256, %s218_s13, [#allocation4]  }
  0x29   : > { %936 = dma.hbm_to_vmem [thread:$0]  (!%p1321_p7), %s261_s9, 16, %s263_s8, %s1325_s15  }
  0x2a   : > { %s285_s16 = sshll.u32 %s278_s6, 4  ;;  %s276_s17 = scalar_lea.sflag [#allocation10], %s1307_s29  ;;  %s286_s16 = int_to_ptr.vmem [resolvable:$true] %s285_s16 }
  0x2b   : > { %939 = dma.hbm_to_vmem [thread:$0]  (!%p1321_p7), %s284_s24, 16, %s286_s16, %s276_s17  }
  0x2c   : > { %294 = sbr.rel (%p1360_p5) target bundleno = 337 (0x151), region = 40 }
  0x31   : > { %1182 = dma.done.wait (%p86_p9), [#allocation4], 256  }
  0x32   : > { %1184 = vsyncadd (%p86_p9), [#allocation4], 4294967040  ;;  %s301_s0 = sand.u32 1, %s1331_s27   ;;  %s1392_s1 = sand.u32 1, %s1203_s19  }
  0x33   : > { %s908_s6 = sshll.u32 %s1392_s1, 10  ;;  %s302_s29 = scalar_lea.sflag [#allocation7], %s301_s0 }
  0x34   : > { %s1395_s14 = scalar_lea.vmem [#allocation6], %s908_s6 }
  0x35   : > { %1186 = dma.done.wait (%p1340_p12), %s302_s29, 16400  }
  0x36   : > { %1188 = vsyncadd (%p1340_p12), %s302_s29, 4294950896  ;;  %s314_s24 = scalar_lea.vmem [#allocation8], %s1392_s1  ;;  %s321_s15 = scalar_lea.sflag [#allocation10], %s1392_s1 }
  0x37   : > { %s323_s10 = scalar_lea.vmem [#allocation9], %s1392_s1 }
  0x38   : > { %1190 = dma.done.wait (%p1340_p12), %s321_s15, 16  }
  0x39   : > { %1192 = vsyncadd (%p1340_p12), %s321_s15, 4294967280  ;;  %v390_v0 = vld [vmem:[%s1395_s14 + $0x78] sm:$0xff]  ;;  %v389_v2 = vld [vmem:[%s1395_s14 + $0x70] sm:$0xff]  ;;  %p364_p7 = scmp.lt.s32.totalorder %s1211_s21, 1  ;;  %vm695_vm0 = vcmask 1041408   ;;  %s909_s25 = sshll.u32 %s1392_s1, 1 }
  0x3a   : > { %v422_v1 = vld [vmem:[%s1395_s14 + $0x178] sm:$0xff]  ;;  %524 = vmatpush.msra.mxu0 %v390_v0  ;;  %v421_v4 = vld [vmem:[%s1395_s14 + $0x170] sm:$0xff]  ;;  %v388_v6 = vld [vmem:[%s1395_s14 + $0x68] sm:$0xff]  ;;  %s911_s26 = sshll.u32 %s1211_s21, 1  ;;  %s361_s0 = scalar_lea.vmem [#allocation11], %s909_s25 }
  0x3b   : > { %564 = vmatpush.msra.mxu2 %v422_v1  ;;  %v406_v3 = vld [vmem:[%s1395_s14 + $0xf8] sm:$0xff]  ;;  %v405_v7 = vld [vmem:[%s1395_s14 + $0xf0] sm:$0xff]  ;;  %v420_v8 = vld [vmem:[%s1395_s14 + $0x168] sm:$0xff]  ;;  %s1538_s27 = scalar_select %p364_p7, %s1211_s21, 1 }
  0x3c   : > { %v438_v5 = vld [vmem:[%s1395_s14 + $0x1f8] sm:$0xff]  ;;  %544 = vmatpush.msra.mxu1 %v406_v3  ;;  %525 = vmatpush.msra.mxu0 %v389_v2  ;;  %v437_v9 = vld [vmem:[%s1395_s14 + $0x1f0] sm:$0xff]  ;;  %v404_v10 = vld [vmem:[%s1395_s14 + $0xe8] sm:$0xff]  ;;  %s756_s17 = scalar_lea.hbm %s1599_s5, %s911_s26  ;;  %s758_s6 = sshll.u32 %s361_s0, 4  ;;  %s759_s6 = int_to_ptr.vmem [resolvable:$true] %s758_s6 }
  0x3d   : > { %584 = vmatpush.msra.mxu3 %v438_v5  ;;  %565 = vmatpush.msra.mxu2 %v421_v4  ;;  %v387_v11 = vld [vmem:[%s1395_s14 + $0x60] sm:$0xff]  ;;  %v436_v13 = vld [vmem:[%s1395_s14 + $0x1e8] sm:$0xff]  ;;  %v386_v16 = vld [vmem:[%s1395_s14 + $0x58] sm:$0xff]  ;;  %s366_s13 = scalar_lea.vmem %s1597_s3, %s1538_s27  ;;  %s760_s21 = sshll.u32 %s756_s17, 4  ;;  %s761_s21 = int_to_ptr.hbm [resolvable:$true] %s760_s21 }
  0x3e   : > { %545 = vmatpush.msra.mxu1 %v405_v7  ;;  %v419_v12 = vld [vmem:[%s1395_s14 + $0x160] sm:$0xff]  ;;  %526 = vmatpush.msra.mxu0 %v388_v6  ;;  %v418_v17 = vld [vmem:[%s1395_s14 + $0x158] sm:$0xff]  ;;  %v385_v20 = vld [vmem:[%s1395_s14 + $0x50] sm:$0xff]  ;;  %s746_s29 = scalar_lea.sflag [#allocation5], %s1392_s1  ;;  %s1149_s27 = scalar_lea.hbm %s1599_s5, 4 }
  0x3f   : > { %585 = vmatpush.msra.mxu3 %v437_v9  ;;  %566 = vmatpush.msra.mxu2 %v420_v8  ;;  %v403_v14 = vld [vmem:[%s1395_s14 + $0xe0] sm:$0xff]  ;;  %v402_v18 = vld [vmem:[%s1395_s14 + $0xd8] sm:$0xff]  ;;  %v417_v21 = vld [vmem:[%s1395_s14 + $0x150] sm:$0xff] }
  0x40   : > { %v435_v15 = vld [vmem:[%s1395_s14 + $0x1e0] sm:$0xff]  ;;  %546 = vmatpush.msra.mxu1 %v404_v10  ;;  %527 = vmatpush.msra.mxu0 %v387_v11  ;;  %v434_v19 = vld [vmem:[%s1395_s14 + $0x1d8] sm:$0xff]  ;;  %v401_v22 = vld [vmem:[%s1395_s14 + $0xd0] sm:$0xff] }
  0x41   : > { %586 = vmatpush.msra.mxu3 %v436_v13  ;;  %567 = vmatpush.msra.mxu2 %v419_v12  ;;  %v433_v23 = vld [vmem:[%s1395_s14 + $0x1d0] sm:$0xff]  ;;  %v384_v24 = vld [vmem:[%s1395_s14 + $0x48] sm:$0xff]  ;;  %v383_v28 = vld [vmem:[%s1395_s14 + $0x40] sm:$0xff] }
  0x42   : > { %547 = vmatpush.msra.mxu1 %v403_v14  ;;  %528 = vmatpush.msra.mxu0 %v386_v16  ;;  %v416_v25 = vld [vmem:[%s1395_s14 + $0x148] sm:$0xff]  ;;  %v415_v29 = vld [vmem:[%s1395_s14 + $0x140] sm:$0xff]  ;;  %v382_v32 = vld [vmem:[%s1395_s14 + $0x38] sm:$0xff] }
  0x43   : > { %587 = vmatpush.msra.mxu3 %v435_v15  ;;  %568 = vmatpush.msra.mxu2 %v418_v17  ;;  %v400_v26 = vld [vmem:[%s1395_s14 + $0xc8] sm:$0xff]  ;;  %v399_v30 = vld [vmem:[%s1395_s14 + $0xc0] sm:$0xff]  ;;  %v414_v33 = vld [vmem:[%s1395_s14 + $0x138] sm:$0xff] }
  0x44   : > { %548 = vmatpush.msra.mxu1 %v402_v18  ;;  %529 = vmatpush.msra.mxu0 %v385_v20  ;;  %v432_v27 = vld [vmem:[%s1395_s14 + $0x1c8] sm:$0xff]  ;;  %v431_v31 = vld [vmem:[%s1395_s14 + $0x1c0] sm:$0xff]  ;;  %v398_v34 = vld [vmem:[%s1395_s14 + $0xb8] sm:$0xff] }
  0x45   : > { %588 = vmatpush.msra.mxu3 %v434_v19  ;;  %569 = vmatpush.msra.mxu2 %v417_v21  ;;  %v430_v35 = vld [vmem:[%s1395_s14 + $0x1b8] sm:$0xff]  ;;  %v381_v36 = vld [vmem:[%s1395_s14 + $0x30] sm:$0xff]  ;;  %v380_v40 = vld [vmem:[%s1395_s14 + $0x28] sm:$0xff] }
  0x46   : > { %549 = vmatpush.msra.mxu1 %v401_v22  ;;  %530 = vmatpush.msra.mxu0 %v384_v24  ;;  %v413_v37 = vld [vmem:[%s1395_s14 + $0x130] sm:$0xff]  ;;  %v412_v41 = vld [vmem:[%s1395_s14 + $0x128] sm:$0xff]  ;;  %v379_v44 = vld [vmem:[%s1395_s14 + $0x20] sm:$0xff] }
  0x47   : > { %589 = vmatpush.msra.mxu3 %v433_v23  ;;  %570 = vmatpush.msra.mxu2 %v416_v25  ;;  %v397_v38 = vld [vmem:[%s1395_s14 + $0xb0] sm:$0xff]  ;;  %v396_v42 = vld [vmem:[%s1395_s14 + $0xa8] sm:$0xff]  ;;  %v411_v45 = vld [vmem:[%s1395_s14 + $0x120] sm:$0xff] }
  0x48   : > { %550 = vmatpush.msra.mxu1 %v400_v26  ;;  %531 = vmatpush.msra.mxu0 %v383_v28  ;;  %v429_v39 = vld [vmem:[%s1395_s14 + $0x1b0] sm:$0xff]  ;;  %v428_v43 = vld [vmem:[%s1395_s14 + $0x1a8] sm:$0xff]  ;;  %v395_v46 = vld [vmem:[%s1395_s14 + $0xa0] sm:$0xff] }
  0x49   : > { %590 = vmatpush.msra.mxu3 %v432_v27  ;;  %571 = vmatpush.msra.mxu2 %v415_v29  ;;  %v427_v47 = vld [vmem:[%s1395_s14 + $0x1a0] sm:$0xff]  ;;  %v378_v48 = vld [vmem:[%s1395_s14 + $0x18] sm:$0xff]  ;;  %v377_v52 = vld [vmem:[%s1395_s14 + $0x10] sm:$0xff] }
  0x4a   : > { %551 = vmatpush.msra.mxu1 %v399_v30  ;;  %532 = vmatpush.msra.mxu0 %v382_v32  ;;  %v410_v49 = vld [vmem:[%s1395_s14 + $0x118] sm:$0xff]  ;;  %v409_v53 = vld [vmem:[%s1395_s14 + $0x110] sm:$0xff]  ;;  %v376_v56 = vld [vmem:[%s1395_s14 + $0x8] sm:$0xff] }
  0x4b   : > { %591 = vmatpush.msra.mxu3 %v431_v31  ;;  %572 = vmatpush.msra.mxu2 %v414_v33  ;;  %v394_v50 = vld [vmem:[%s1395_s14 + $0x98] sm:$0xff]  ;;  %v393_v54 = vld [vmem:[%s1395_s14 + $0x90] sm:$0xff]  ;;  %v408_v57 = vld [vmem:[%s1395_s14 + $0x108] sm:$0xff] }
  0x4c   : > { %552 = vmatpush.msra.mxu1 %v398_v34  ;;  %533 = vmatpush.msra.mxu0 %v381_v36  ;;  %v426_v51 = vld [vmem:[%s1395_s14 + $0x198] sm:$0xff]  ;;  %v425_v55 = vld [vmem:[%s1395_s14 + $0x190] sm:$0xff]  ;;  %v392_v58 = vld [vmem:[%s1395_s14 + $0x88] sm:$0xff] }
  0x4d   : > { %592 = vmatpush.msra.mxu3 %v430_v35  ;;  %573 = vmatpush.msra.mxu2 %v413_v37  ;;  %v424_v59 = vld [vmem:[%s1395_s14 + $0x188] sm:$0xff]  ;;  %v375_v60 = vld [vmem:[%s1395_s14] sm:$0xff]  ;;  %v454_v62 = vld [vmem:[%s1395_s14 + $0x278] sm:$0xff] }
  0x4e   : > { %553 = vmatpush.msra.mxu1 %v397_v38  ;;  %534 = vmatpush.msra.mxu0 %v380_v40  ;;  %v407_v61 = vld [vmem:[%s1395_s14 + $0x100] sm:$0xff]  ;;  %v486_v63 = vld [vmem:[%s1395_s14 + $0x378] sm:$0xff]  ;;  %v453_v2 = vld [vmem:[%s1395_s14 + $0x270] sm:$0xff] }
  0x4f   : > { %593 = vmatpush.msra.mxu3 %v429_v39  ;;  %574 = vmatpush.msra.mxu2 %v412_v41  ;;  %v391_v0 = vld [vmem:[%s1395_s14 + $0x80] sm:$0xff]  ;;  %v470_v3 = vld [vmem:[%s1395_s14 + $0x2f8] sm:$0xff]  ;;  %v485_v4 = vld [vmem:[%s1395_s14 + $0x370] sm:$0xff] }
  0x50   : > { %554 = vmatpush.msra.mxu1 %v396_v42  ;;  %535 = vmatpush.msra.mxu0 %v379_v44  ;;  %v423_v1 = vld [vmem:[%s1395_s14 + $0x180] sm:$0xff]  ;;  %v502_v5 = vld [vmem:[%s1395_s14 + $0x3f8] sm:$0xff]  ;;  %v452_v6 = vld [vmem:[%s1395_s14 + $0x268] sm:$0xff] }
  0x51   : > { %594 = vmatpush.msra.mxu3 %v428_v43  ;;  %575 = vmatpush.msra.mxu2 %v411_v45  ;;  %v469_v7 = vld [vmem:[%s1395_s14 + $0x2f0] sm:$0xff]  ;;  %v484_v8 = vld [vmem:[%s1395_s14 + $0x368] sm:$0xff]  ;;  %v451_v10 = vld [vmem:[%s1395_s14 + $0x260] sm:$0xff] }
  0x52   : > { %555 = vmatpush.msra.mxu1 %v395_v46  ;;  %536 = vmatpush.msra.mxu0 %v378_v48  ;;  %v501_v9 = vld [vmem:[%s1395_s14 + $0x3f0] sm:$0xff]  ;;  %v468_v11 = vld [vmem:[%s1395_s14 + $0x2e8] sm:$0xff]  ;;  %v483_v13 = vld [vmem:[%s1395_s14 + $0x360] sm:$0xff] }
  0x53   : > { %595 = vmatpush.msra.mxu3 %v427_v47  ;;  %576 = vmatpush.msra.mxu2 %v410_v49  ;;  %v373_v12 = vld [vmem:[#allocation3] sm:$0xff]  ;;  %v500_v14 = vld [vmem:[%s1395_s14 + $0x3e8] sm:$0xff]  ;;  %v450_v15 = vld [vmem:[%s1395_s14 + $0x258] sm:$0xff] }
  0x54   : > { %556 = vmatpush.msra.mxu1 %v394_v50  ;;  %537 = vmatpush.msra.mxu0 %v377_v52  ;;  %505 = vst [vmem:[#allocation1] ss:$4 sm:$0xff] %v373_v12  ;;  %v467_v16 = vld [vmem:[%s1395_s14 + $0x2e0] sm:$0xff]  ;;  %v482_v17 = vld [vmem:[%s1395_s14 + $0x358] sm:$0xff]  ;;  %v449_v19 = vld [vmem:[%s1395_s14 + $0x250] sm:$0xff] }
  0x55   : > { %596 = vmatpush.msra.mxu3 %v426_v51  ;;  %577 = vmatpush.msra.mxu2 %v409_v53  ;;  %v499_v18 = vld [vmem:[%s1395_s14 + $0x3e0] sm:$0xff]  ;;  %v466_v20 = vld [vmem:[%s1395_s14 + $0x2d8] sm:$0xff]  ;;  %v481_v21 = vld [vmem:[%s1395_s14 + $0x350] sm:$0xff] }
  0x56   : > { %557 = vmatpush.msra.mxu1 %v393_v54  ;;  %538 = vmatpush.msra.mxu0 %v376_v56  ;;  %v498_v22 = vld [vmem:[%s1395_s14 + $0x3d8] sm:$0xff]  ;;  %v448_v23 = vld [vmem:[%s1395_s14 + $0x248] sm:$0xff]  ;;  %v465_v24 = vld [vmem:[%s1395_s14 + $0x2d0] sm:$0xff] }
  0x57   : > { %597 = vmatpush.msra.mxu3 %v425_v55  ;;  %578 = vmatpush.msra.mxu2 %v408_v57  ;;  %v480_v25 = vld [vmem:[%s1395_s14 + $0x348] sm:$0xff]  ;;  %v497_v26 = vld [vmem:[%s1395_s14 + $0x3d0] sm:$0xff]  ;;  %v374_v27 = vld [vmem:[#allocation3 + $0x8] sm:$0xff] }
  0x58   : > { %558 = vmatpush.msra.mxu1 %v392_v58  ;;  %539 = vmatpush.msra.mxu0 %v375_v60  ;;  %v447_v28 = vld [vmem:[%s1395_s14 + $0x240] sm:$0xff]  ;;  %v464_v29 = vld [vmem:[%s1395_s14 + $0x2c8] sm:$0xff]  ;;  %v446_v32 = vld [vmem:[%s1395_s14 + $0x238] sm:$0xff]  ;;  %507 = vst [vmem:[#allocation1 + $0x20] ss:$4 sm:$0xff] %v374_v27 }
  0x59   : > { %598 = vmatpush.msra.mxu3 %v424_v59  ;;  %579 = vmatpush.msra.mxu2 %v407_v61  ;;  %v479_v30 = vld [vmem:[%s1395_s14 + $0x340] sm:$0xff]  ;;  %v496_v31 = vld [vmem:[%s1395_s14 + $0x3c8] sm:$0xff]  ;;  %v478_v34 = vld [vmem:[%s1395_s14 + $0x338] sm:$0xff] }
  0x5a   : > { %604 = vmatpush.msrb.mxu0 %v454_v62  ;;  %559 = vmatpush.msra.mxu1 %v391_v0  ;;  %v463_v33 = vld [vmem:[%s1395_s14 + $0x2c0] sm:$0xff]  ;;  %v445_v36 = vld [vmem:[%s1395_s14 + $0x230] sm:$0xff]  ;;  %v462_v37 = vld [vmem:[%s1395_s14 + $0x2b8] sm:$0xff] }
  0x5b   : > { %644 = vmatpush.msrb.mxu2 %v486_v63  ;;  %599 = vmatpush.msra.mxu3 %v423_v1  ;;  %v495_v35 = vld [vmem:[%s1395_s14 + $0x3c0] sm:$0xff]  ;;  %v477_v38 = vld [vmem:[%s1395_s14 + $0x330] sm:$0xff]  ;;  %v494_v39 = vld [vmem:[%s1395_s14 + $0x3b8] sm:$0xff] }
  0x5c   : > { %605 = vmatpush.msrb.mxu0 %v453_v2  ;;  %624 = vmatpush.msrb.mxu1 %v470_v3  ;;  %v444_v40 = vld [vmem:[%s1395_s14 + $0x228] sm:$0xff]  ;;  %v461_v41 = vld [vmem:[%s1395_s14 + $0x2b0] sm:$0xff]  ;;  %v443_v45 = vld [vmem:[%s1395_s14 + $0x220] sm:$0xff] }
  0x5d   : > { %645 = vmatpush.msrb.mxu2 %v485_v4  ;;  %664 = vmatpush.msrb.mxu3 %v502_v5  ;;  %v476_v42 = vld [vmem:[%s1395_s14 + $0x328] sm:$0xff]  ;;  %v493_v43 = vld [vmem:[%s1395_s14 + $0x3b0] sm:$0xff]  ;;  %v475_v47 = vld [vmem:[%s1395_s14 + $0x320] sm:$0xff] }
  0x5e   : > { %606 = vmatpush.msrb.mxu0 %v452_v6  ;;  %625 = vmatpush.msrb.mxu1 %v469_v7  ;;  %v510_v44 = vld.sshfl [vmem:[#allocation1 + $0x10] sm:$0xff pattern:$0x73625140]  ;;  %v460_v46 = vld [vmem:[%s1395_s14 + $0x2a8] sm:$0xff]  ;;  %v459_v52 = vld [vmem:[%s1395_s14 + $0x2a0] sm:$0xff] }
  0x5f   : > { %646 = vmatpush.msrb.mxu2 %v484_v8  ;;  %665 = vmatpush.msrb.mxu3 %v501_v9  ;;  %v492_v48 = vld [vmem:[%s1395_s14 + $0x3a8] sm:$0xff]  ;;  %v511_v50 = vld.sshfl [vmem:[#allocation1 + $0x18] sm:$0xff pattern:$0x73625140]  ;;  %v441_v56 = vld [vmem:[%s1395_s14 + $0x210] sm:$0xff] }
  0x60   : > { %607 = vmatpush.msrb.mxu0 %v451_v10  ;;  %626 = vmatpush.msrb.mxu1 %v468_v11  ;;  %v508_v49 = vld.sshfl [vmem:[#allocation1] sm:$0xff pattern:$0x73625140]  ;;  %v442_v51 = vld [vmem:[%s1395_s14 + $0x218] sm:$0xff]  ;;  %v473_v58 = vld [vmem:[%s1395_s14 + $0x310] sm:$0xff]  ;;  %v1225_v10 = vmov 0.0  }
  0x61   : > { %647 = vmatpush.msrb.mxu2 %v483_v13  ;;  %666 = vmatpush.msrb.mxu3 %v500_v14  ;;  %v474_v53 = vld [vmem:[%s1395_s14 + $0x318] sm:$0xff]  ;;  %v491_v54 = vld [vmem:[%s1395_s14 + $0x3a0] sm:$0xff]  ;;  %v509_v55 = vld.sshfl [vmem:[#allocation1 + $0x8] sm:$0xff pattern:$0x73625140] }
  0x62   : > { %608 = vmatpush.msrb.mxu0 %v450_v15  ;;  %627 = vmatpush.msrb.mxu1 %v467_v16  ;;  %v458_v57 = vld [vmem:[%s1395_s14 + $0x298] sm:$0xff]  ;;  %v440_v60 = vld [vmem:[%s1395_s14 + $0x208] sm:$0xff]  ;;  %v457_v61 = vld [vmem:[%s1395_s14 + $0x290] sm:$0xff]  ;;  %371 = vst [vmem:[#allocation2] sm:$0x3] %v1225_v10 }
  0x63   : > { %648 = vmatpush.msrb.mxu2 %v482_v17  ;;  %667 = vmatpush.msrb.mxu3 %v499_v18  ;;  %v490_v59 = vld [vmem:[%s1395_s14 + $0x398] sm:$0xff]  ;;  %v472_v62 = vld [vmem:[%s1395_s14 + $0x308] sm:$0xff]  ;;  %v489_v63 = vld [vmem:[%s1395_s14 + $0x390] sm:$0xff] }
  0x64   : > { %609 = vmatpush.msrb.mxu0 %v449_v19  ;;  %628 = vmatpush.msrb.mxu1 %v466_v20  ;;  %v439_v0 = vld [vmem:[%s1395_s14 + $0x200] sm:$0xff]  ;;  %v456_v1 = vld [vmem:[%s1395_s14 + $0x288] sm:$0xff]  ;;  %v514_v5 = vld.sshfl [vmem:[#allocation1 + $0x30] sm:$0xff pattern:$0x73625140] }
  0x65   : > { %649 = vmatpush.msrb.mxu2 %v481_v21  ;;  %668 = vmatpush.msrb.mxu3 %v498_v22  ;;  %v471_v2 = vld [vmem:[%s1395_s14 + $0x300] sm:$0xff]  ;;  %v488_v3 = vld [vmem:[%s1395_s14 + $0x388] sm:$0xff] }
  0x66   : > { %610 = vmatpush.msrb.mxu0 %v448_v23  ;;  %629 = vmatpush.msrb.mxu1 %v465_v24  ;;  %v512_v4 = vld.sshfl [vmem:[#allocation1 + $0x20] sm:$0xff pattern:$0x73625140]  ;;  %v513_v8 = vld.sshfl [vmem:[#allocation1 + $0x28] sm:$0xff pattern:$0x73625140] }
  0x67   : > { %650 = vmatpush.msrb.mxu2 %v480_v25  ;;  %669 = vmatpush.msrb.mxu3 %v497_v26  ;;  %v455_v6 = vld [vmem:[%s1395_s14 + $0x280] sm:$0xff]  ;;  %v1226_v26 = vmov 2.0  }
  0x68   : > { %611 = vmatpush.msrb.mxu0 %v447_v28  ;;  %630 = vmatpush.msrb.mxu1 %v464_v29  ;;  %v487_v7 = vld [vmem:[%s1395_s14 + $0x380] sm:$0xff]  ;;  %1005 = vrcp.f32 %v1226_v26  ;;  %s1143_s14 = sshra.s32 %s761_s21, 4  ;;  %s1144_s14 = int_to_ptr.hbm [resolvable:$true] %s1143_s14 }
  0x69   : > { %651 = vmatpush.msrb.mxu2 %v479_v30  ;;  %670 = vmatpush.msrb.mxu3 %v496_v31  ;;  %v515_v9 = vld.sshfl [vmem:[#allocation1 + $0x38] sm:$0xff pattern:$0x73625140]  ;;  %v372_v24 = vld [vmem:[#allocation2] sm:$0x3]  ;;  %p1150_p11 = scmp.lt.s32.totalorder %s1144_s14, %s1599_s5 }
  0x6a   : > { %612 = vmatpush.msrb.mxu0 %v446_v32  ;;  %631 = vmatpush.msrb.mxu1 %v463_v33  ;;  %v1002_v30 = vld [vmem:[%s314_s24] ss:$0 sm:$0xff]  ;;  %s1145_s24 = scalar_lea.hbm %s1144_s14, 2 }
  0x6b   : > { %652 = vmatpush.msrb.mxu2 %v478_v34  ;;  %671 = vmatpush.msrb.mxu3 %v495_v35  ;;  %p1146_p8 = scmp.ne.s32.totalorder %s1144_s14, %s1145_s24  ;;  %p1151_p12 = scmp.lt.s32.totalorder %s1149_s27, %s1145_s24 }
  0x6c   : > { %613 = vmatpush.msrb.mxu0 %v445_v36  ;;  %632 = vmatpush.msrb.mxu1 %v462_v37 }
  0x6d   : > { %653 = vmatpush.msrb.mxu2 %v477_v38  ;;  %672 = vmatpush.msrb.mxu3 %v494_v39  ;;  %p1147_p9 = pnand %p1146_p8, %p1348_p0  ;;  %p1152_p13 = por %p1151_p12, %p1150_p11 }
  0x6e   : > { %614 = vmatpush.msrb.mxu0 %v444_v40  ;;  %633 = vmatpush.msrb.mxu1 %v461_v41  ;;  %v1006_v29 = vpop.eup %1005 }
  0x6f   : > { %654 = vmatpush.msrb.mxu2 %v476_v42  ;;  %673 = vmatpush.msrb.mxu3 %v493_v43  ;;  %v704_v31 = vmul.f32 2.0, %v1006_v29  ;;  %vm708_vm1 = vweird.f32 %v1006_v29  ;;  %p1148_p10 = pneg %p1147_p9 }
  0x70   : > { %580 = vmatmul.f32.vlgmr.msra.gmra.mxu2 %v510_v44  ;;  %615 = vmatpush.msrb.mxu0 %v443_v45 }
  0x71   : > { %634 = vmatpush.msrb.mxu1 %v460_v46  ;;  %655 = vmatpush.msrb.mxu2 %v475_v47  ;;  %v705_v34 = vsub.f32 1.0, %v704_v31  ;;  %p1153_p4 = pnand %p1152_p13, %p1148_p10 }
  0x72   : > { %674 = vmatpush.msrb.mxu3 %v492_v48  ;;  %540 = vmatmul.f32.vlgmr.msra.gmra.mxu0 %v508_v49 }
  0x73   : > { %600 = vmatmul.f32.vlgmr.msra.gmra.mxu3 %v511_v50  ;;  %616 = vmatpush.msrb.mxu0 %v442_v51  ;;  %v706_v37 = vmul.f32 %v1006_v29, %v705_v34 }
  0x74   : > { %635 = vmatpush.msrb.mxu1 %v459_v52  ;;  %656 = vmatpush.msrb.mxu2 %v474_v53 }
  0x75   : > { %675 = vmatpush.msrb.mxu3 %v491_v54  ;;  %560 = vmatmul.f32.vlgmr.msra.gmra.mxu1 %v509_v55  ;;  %v707_v40 = vadd.f32 %v1006_v29, %v706_v37 }
  0x76   : > { %617 = vmatpush.msrb.mxu0 %v441_v56  ;;  %636 = vmatpush.msrb.mxu1 %v458_v57 }
  0x77   : > { %657 = vmatpush.msrb.mxu2 %v473_v58  ;;  %676 = vmatpush.msrb.mxu3 %v490_v59  ;;  %v709_v43 = vsel %vm708_vm1, %v1006_v29, %v707_v40 }
  0x78   : > { %618 = vmatpush.msrb.mxu0 %v440_v60  ;;  %637 = vmatpush.msrb.mxu1 %v457_v61 }
  0x79   : > { %658 = vmatpush.msrb.mxu2 %v472_v62  ;;  %677 = vmatpush.msrb.mxu3 %v489_v63  ;;  %v1003_v63 = vld [vmem:[%s366_s13] ss:$0 sm:$0xff] }
  0x7a   : > { %619 = vmatpush.msrb.mxu0 %v439_v0  ;;  %638 = vmatpush.msrb.mxu1 %v456_v1 }
  0x7b   : > { %659 = vmatpush.msrb.mxu2 %v471_v2  ;;  %678 = vmatpush.msrb.mxu3 %v488_v3  ;;  %v1004_v2 = vld [vmem:[%s323_s10] ss:$0 sm:$0xff] }
  0x7c   : > { %620 = vmatmul.f32.vlgmr.msrb.gmra.mxu0 %v512_v4  ;;  %660 = vmatmul.f32.vlgmr.msrb.gmra.mxu2 %v514_v5 }
  0x7d   : > { %639 = vmatpush.msrb.mxu1 %v455_v6  ;;  %679 = vmatpush.msrb.mxu3 %v487_v7 }
  0x7e   : > { %640 = vmatmul.f32.vlgmr.msrb.gmra.mxu1 %v513_v8  ;;  %680 = vmatmul.f32.vlgmr.msrb.gmra.mxu3 %v515_v9 }
  0xef   : > { %v541_v11 = vpop.f32.mrf.mxu0 }
  0xf2   : > { %v561_v12 = vpop.f32.mrf.mxu1 }
  0xf3   : > { %v562_v13 = vadd.f32 %v561_v12, %v541_v11  ;;  %v581_v14 = vpop.f32.mrf.mxu2 }
  0xf5   : > { %v582_v15 = vadd.f32 %v581_v14, %v562_v13 }
  0xf6   : > { %v601_v16 = vpop.f32.mrf.mxu3 }
  0xf7   : > { %v602_v17 = vadd.f32 %v601_v16, %v582_v15 }
  0xf9   : > { %v621_v18 = vpop.f32.mrf.mxu0 }
  0xfa   : > { %v622_v19 = vadd.f32 %v621_v18, %v602_v17 }
  0xfb   : > { %v641_v20 = vpop.f32.mrf.mxu1 }
  0xfc   : > { %v642_v21 = vadd.f32 %v641_v20, %v622_v19 }
  0xff   : > { %v661_v22 = vpop.f32.mrf.mxu2 }
 0x100   : > { %v662_v23 = vadd.f32 %v661_v22, %v642_v21 }
 0x101   : > { %v681_v25 = vpop.f32.mrf.mxu3 }
 0x102   : > { %v682_v27 = vadd.f32 %v681_v25, %v662_v23 }
 0x104   : > { %v684_v28 = vadd.f32 %v682_v27, %v372_v24 }
 0x106   : > { %685 = vst [vmem:[#allocation2] sm:$0x3] %v684_v28 }
 0x10d   : > { %v689_v32 = vld [vmem:[#allocation2] sm:$0x3] }
 0x10e   : > { %v694_v33 = vadd.f32 %v1002_v30, %v689_v32 }
 0x110   : > { %v696_v35 = vsel %vm695_vm0, %v694_v33, 0.0 }
 0x111   : > { %v697_v36 = vrot.slane %v696_v35, 4 }
 0x113   : > { %v698_v38 = vadd.f32 %v697_v36, %v696_v35 }
 0x115   : > { %v699_v39 = vrot.slane %v698_v38, 2 }
 0x117   : > { %v700_v41 = vadd.f32 %v699_v39, %v698_v38 }
 0x119   : > { %v701_v42 = vrot.slane %v700_v41, 1 }
 0x11b   : > { %v702_v44 = vadd.f32 %v701_v42, %v700_v41 }
 0x11d   : > { %v710_v45 = vmul.f32 %v709_v43, %v702_v44 }
 0x11f   : > { %v711_v46 = vsub.f32 %v694_v33, %v710_v45 }
 0x121   : > { %v712_v47 = vmul.f32 %v711_v46, %v711_v46 }
 0x123   : > { %v713_v48 = vsel %vm695_vm0, %v712_v47, 0.0 }
 0x124   : > { %v714_v49 = vrot.slane %v713_v48, 4 }
 0x126   : > { %v715_v50 = vadd.f32 %v714_v49, %v713_v48 }
 0x128   : > { %v716_v51 = vrot.slane %v715_v50, 2 }
 0x12a   : > { %v717_v52 = vadd.f32 %v716_v51, %v715_v50 }
 0x12c   : > { %v718_v53 = vrot.slane %v717_v52, 1 }
 0x12e   : > { %v719_v54 = vadd.f32 %v718_v53, %v717_v52 }
 0x130   : > { %v720_v55 = vmul.f32 %v719_v54, %v709_v43 }
 0x132   : > { %v721_v56 = vadd.f32 1e-05, %v720_v55 }
 0x134   : > { %1007 = vrsqrt.f32 %v721_v56  ;;  %vm728_vm3 = vweird.f32 %v721_v56 }
 0x13a   : > { %v1008_v57 = vpop.eup %1007 }
 0x13b   : > { %v723_v58 = vmul.f32 %v1008_v57, %v721_v56  ;;  %vm729_vm2 = vweird.f32 %v1008_v57 }
 0x13c   : > { %vm730_vm4 = vmor %vm728_vm3, %vm729_vm2 }
 0x13d   : > { %v724_v59 = vmul.f32 %v1008_v57, %v723_v58 }
 0x13f   : > { %v725_v60 = vmul.f32 0.5, %v724_v59 }
 0x141   : > { %v726_v61 = vsub.f32 1.5, %v725_v60 }
 0x143   : > { %v727_v62 = vmul.f32 %v1008_v57, %v726_v61 }
 0x145   : > { %v731_v0 = vsel %vm730_vm4, %v1008_v57, %v727_v62 }
 0x146   : > { %v732_v1 = vmul.f32 %v731_v0, %v711_v46 }
 0x148   : > { %v737_v3 = vmul.f32 %v1003_v63, %v732_v1 }
 0x14a   : > { %v742_v4 = vadd.f32 %v1004_v2, %v737_v3 }
 0x14c   : > { %v743_v5 = vmax.f32 %v742_v4, 0.0 }
 0x14e   : > { %744 = vst [vmem:[%s361_s0] sm:$0x3] %v743_v5 }
 0x14f   : > { %1156 = shalt.err (!%p1153_p4)
}
 0x150   : > { %924 = dma.vmem_to_hbm [thread:$0]  (%p1348_p0), %s759_s6, 32, %s761_s21, %s746_s29  }
 0x151 PF: > { %s772_s1 = sand.u32 1, %s1199_s18   ;;  %p941_p5 = pnand %p903_p3, %p1352_p2 }
 0x152   : > { %s773_s13 = scalar_lea.sflag [#allocation5], %s772_s1 }
 0x153   : > { %p942_p1 = pneg %p941_p5 }
 0x155   : > { %1194 = dma.done.wait (%p942_p1), %s773_s13, 32  }
 0x156   : > { %1196 = vsyncadd (%p942_p1), %s773_s13, 4294967264  ;;  %s25_s23 = sadd.s32 1, %s1219_s23   ;;  %s1613_s25 = sld [smem:[#allocation17_spill]] }
 0x157   : > { %p22_p6 = scmp.ge.s32.totalorder %s25_s23, 4   ;;  %s1614_s30 = sld [smem:[#allocation16_spill]] }
 0x158   : > { %s1615_s18 = smov %s1203_s19  ;;  %s1616_s19 = smov %s1207_s20 }
 0x159   : > { %s1618_s21 = smov %s1215_s22  ;;  %24 = sbr.rel (!%p22_p6) target bundleno = 12 (0xc), region = 127 }
 0x15c   : > { %s1617_s20 = smov %s1613_s25 }
 0x15d   : > { %s1619_s22 = smov %s1614_s30 }
 0x15e   :  { %779 = vsyncpa [#allocation4], 1 }
 0x15f   :  { %781 = vsyncpa [#allocation4 + $0x1], 1 }
 0x160   :  { %782 = vsyncpa [#allocation7], 1 }
 0x161   :  { %784 = vsyncpa [#allocation7 + $0x1], 1 }
 0x162   :  { %785 = vsyncpa [#allocation10], 1 }
 0x163   :  { %787 = vsyncpa [#allocation10 + $0x1], 1 }
 0x164   :  { %788 = vsyncpa [#allocation5], 1 }
 0x165   :  { %790 = vsyncpa [#allocation5 + $0x1], 1 }

</bundles_post_ra>
